<compile_context>
chip_gen: v7x
topology: tpu7x:2x2x1
jax: 0.10.0
libtpu: 0.0.40
codegen_flags: <defaults>
</compile_context>

<pallas_src>
import jax
import jax.numpy as jnp
from jax.experimental import pallas as pl
from jax.experimental.pallas import tpu as pltpu


HIDDEN = 256


def _critic_kernel(state_ref, action_ref,
                   w1s_ref, w1a_ref, b14_ref,     # fused layer-1 (both heads)
                   w2_ref, b2_ref,                # Q1 layer 2
                   w5_ref, b5_ref,                # Q2 layer 2
                   w36_ref, b36_ref,              # fused layer-3 (block-diag [2H, 2])
                   q_ref):
    f32 = jnp.float32
    state = state_ref[...]                         # [B, S]  f32
    action = action_ref[...]                       # [B, A]  f32

    # ---- fused first layer (both heads): sa @ [w1 | w4] + [b1 | b4] ----
    # computed as state @ W_s + action @ W_a so no host-side concat is needed.
    hg = (jnp.dot(state, w1s_ref[...].astype(f32), preferred_element_type=f32)
          + jnp.dot(action, w1a_ref[...].astype(f32), preferred_element_type=f32)
          + b14_ref[...])
    hg = jnp.maximum(hg, 0.0)                      # relu, [B, 2H]
    h = hg[:, :HIDDEN]                             # Q1 branch
    g = hg[:, HIDDEN:]                             # Q2 branch

    # ---- per-head second layer (kept separate: block-diag would double DMA) ----
    h = jnp.maximum(
        jnp.dot(h, w2_ref[...].astype(f32), preferred_element_type=f32) + b2_ref[...], 0.0)
    g = jnp.maximum(
        jnp.dot(g, w5_ref[...].astype(f32), preferred_element_type=f32) + b5_ref[...], 0.0)

    # ---- fused final projections: [h | g] @ blockdiag(w3, w6) + [b3 | b6] ----
    hg2 = jnp.concatenate([h, g], axis=1)          # [B, 2H]  (lane-aligned concat)
    q = jnp.dot(hg2, w36_ref[...].astype(f32), preferred_element_type=f32) + b36_ref[...]
    q_ref[...] = q.astype(q_ref.dtype)             # [B, 2]: q1 in col 0, q2 in col 1


def critic_forward(state, action, params):
    """Pallas equivalent of Critic.forward: returns (q1, q2), each [B, 1]."""
    B, state_dim = state.shape
    action_dim = action.shape[1]

    args = (state, action,
            params["w1_s"], params["w1_a"], params["b14"],
            params["w2"], params["b2"],
            params["w5"], params["b5"],
            params["w36"], params["b36"])

    vmem = pl.BlockSpec(memory_space=pltpu.MemorySpace.VMEM)

    flops = 2 * B * ((state_dim + action_dim) * 2 * HIDDEN   # fused layer 1
                     + 2 * HIDDEN * HIDDEN                    # two layer-2 dots
                     + 2 * HIDDEN * 2)                        # fused layer 3
    param_bytes = sum(int(p.size) * p.dtype.itemsize for p in args[2:])
    io_bytes = (B * (state_dim + action_dim) + B * 2) * 4
    cost = pl.CostEstimate(flops=flops, transcendentals=0,
                           bytes_accessed=param_bytes + io_bytes)

    q = pl.pallas_call(
        _critic_kernel,
        out_shape=jax.ShapeDtypeStruct((B, 2), jnp.float32),
        in_specs=[vmem] * len(args),
        out_specs=vmem,
        cost_estimate=cost,
    )(*args)
    return q[:, 0:1], q[:, 1:2]


def _pack_params(raw, state_dim, action_dim):
    """Build the fused kernel-side parameter layout from per-layer params."""
    del action_dim  # implied by w1 shape
    # Fused layer-1 weight [sa_dim, 2H], split into state / action row blocks.
    w14 = jnp.concatenate([raw["w1"], raw["w4"]], axis=1)          # bf16
    b14 = jnp.concatenate([raw["b1"], raw["b4"]], axis=1)          # f32 [1, 2H]
    # Fused block-diagonal layer-3 weight [2H, 2].
    w36 = jnp.zeros((2 * HIDDEN, 2), dtype=jnp.bfloat16)
    w36 = w36.at[:HIDDEN, 0:1].set(raw["w3"])
    w36 = w36.at[HIDDEN:, 1:2].set(raw["w6"])
    b36 = jnp.concatenate([raw["b3"], raw["b6"]], axis=1)          # f32 [1, 2]
    return {
        "w1_s": w14[:state_dim], "w1_a": w14[state_dim:], "b14": b14,
        "w2": raw["w2"], "b2": raw["b2"],
        "w5": raw["w5"], "b5": raw["b5"],
        "w36": w36, "b36": b36,
    }


def init_critic_params(key, state_dim, action_dim):
    """PyTorch nn.Linear-style uniform init.

    Weights are stored as [in_features, out_features] (transposed vs PyTorch)
    and in bfloat16 (halves per-call weight DMA); biases stay float32.
    Returns (raw_per_layer_params, fused_kernel_params).
    """
    sa_dim = state_dim + action_dim
    dims = [(sa_dim, HIDDEN), (HIDDEN, HIDDEN), (HIDDEN, 1),
            (sa_dim, HIDDEN), (HIDDEN, HIDDEN), (HIDDEN, 1)]
    raw = {}
    keys = jax.random.split(key, 2 * len(dims))
    for i, (fan_in, fan_out) in enumerate(dims):
        bound = float(fan_in) ** -0.5
        w = jax.random.uniform(keys[2 * i], (fan_in, fan_out),
                               minval=-bound, maxval=bound, dtype=jnp.float32)
        b = jax.random.uniform(keys[2 * i + 1], (1, fan_out),
                               minval=-bound, maxval=bound, dtype=jnp.float32)
        raw[f"w{i + 1}"] = w.astype(jnp.bfloat16)
        raw[f"b{i + 1}"] = b
    return raw, _pack_params(raw, state_dim, action_dim)


def critic_forward_ref(state, action, raw):
    """Pure-JAX reference (same bf16-stored weights, f32 compute)."""
    w = lambda k: raw[k].astype(jnp.float32)
    sa = jnp.concatenate([state, action], axis=1)
    h = jax.nn.relu(sa @ w("w1") + raw["b1"])
    h = jax.nn.relu(h @ w("w2") + raw["b2"])
    q1 = h @ w("w3") + raw["b3"]
    g = jax.nn.relu(sa @ w("w4") + raw["b4"])
    g = jax.nn.relu(g @ w("w5") + raw["b5"])
    q2 = g @ w("w6") + raw["b6"]
    return q1, q2


if __name__ == "__main__":
    key = jax.random.PRNGKey(0)
    k_params, k_state, k_action = jax.random.split(key, 3)

    batch = 8            # multiple of 8 (f32 sublane tile)
    state_dim = 24
    action_dim = 8

    raw, fused = init_critic_params(k_params, state_dim, action_dim)
    state = jax.random.normal(k_state, (batch, state_dim), dtype=jnp.float32)
    action = jax.random.normal(k_action, (batch, action_dim), dtype=jnp.float32)

    q1, q2 = critic_forward(state, action, fused)
    q1 = jax.block_until_ready(q1)
    q2 = jax.block_until_ready(q2)

    q1_ref, q2_ref = critic_forward_ref(state, action, raw)
    assert q1.shape == (batch, 1) and q2.shape == (batch, 1)
    assert jnp.allclose(q1, q1_ref, atol=1e-4, rtol=1e-4)
    assert jnp.allclose(q2, q2_ref, atol=1e-4, rtol=1e-4)

    print("KERNEL_OK")
</pallas_src>

<mosaic_0001>
module attributes {stable_mosaic.version = 11 : i64} {
  func.func @_critic_kernel(%arg0: memref<8x24xf32, #tpu.memory_space<vmem>>, %arg1: memref<8x8xf32, #tpu.memory_space<vmem>>, %arg2: memref<24x512xbf16, #tpu.memory_space<vmem>>, %arg3: memref<8x512xbf16, #tpu.memory_space<vmem>>, %arg4: memref<1x512xf32, #tpu.memory_space<vmem>>, %arg5: memref<256x256xbf16, #tpu.memory_space<vmem>>, %arg6: memref<1x256xf32, #tpu.memory_space<vmem>>, %arg7: memref<256x256xbf16, #tpu.memory_space<vmem>>, %arg8: memref<1x256xf32, #tpu.memory_space<vmem>>, %arg9: memref<512x2xbf16, #tpu.memory_space<vmem>>, %arg10: memref<1x2xf32, #tpu.memory_space<vmem>>, %arg11: memref<8x2xf32, #tpu.memory_space<vmem>>) attributes {dimension_semantics = [], scalar_prefetch = 0 : i64, scratch_operands = 0 : i64, tpu.core_type = #tpu.core_type<tc>} {
    %c0 = arith.constant 0 : index
    %c0_0 = arith.constant 0 : index
    %0 = vector.load %arg0[%c0, %c0_0] : memref<8x24xf32, #tpu.memory_space<vmem>>, vector<8x24xf32>
    %c0_1 = arith.constant 0 : index
    %c0_2 = arith.constant 0 : index
    %1 = vector.load %arg1[%c0_1, %c0_2] : memref<8x8xf32, #tpu.memory_space<vmem>>, vector<8x8xf32>
    %c0_3 = arith.constant 0 : index
    %c0_4 = arith.constant 0 : index
    %2 = vector.load %arg2[%c0_3, %c0_4] : memref<24x512xbf16, #tpu.memory_space<vmem>>, vector<24x512xbf16>
    %3 = arith.extf %2 : vector<24x512xbf16> to vector<24x512xf32>
    %cst = arith.constant dense<0.000000e+00> : vector<8x512xf32>
    %4 = tpu.matmul %0, %3, %cst {dimension_numbers = #tpu.dot_dimension_numbers<[1], [0], [0], [1], [0, 0, 1, 1], [], []>} : vector<8x24xf32>, vector<24x512xf32>, vector<8x512xf32> -> vector<8x512xf32>
    %c0_5 = arith.constant 0 : index
    %c0_6 = arith.constant 0 : index
    %5 = vector.load %arg3[%c0_5, %c0_6] : memref<8x512xbf16, #tpu.memory_space<vmem>>, vector<8x512xbf16>
    %6 = arith.extf %5 : vector<8x512xbf16> to vector<8x512xf32>
    %cst_7 = arith.constant dense<0.000000e+00> : vector<8x512xf32>
    %7 = tpu.matmul %1, %6, %cst_7 {dimension_numbers = #tpu.dot_dimension_numbers<[1], [0], [0], [1], [0, 0, 1, 1], [], []>} : vector<8x8xf32>, vector<8x512xf32>, vector<8x512xf32> -> vector<8x512xf32>
    %8 = arith.addf %4, %7 : vector<8x512xf32>
    %c0_8 = arith.constant 0 : index
    %c0_9 = arith.constant 0 : index
    %9 = vector.load %arg4[%c0_8, %c0_9] : memref<1x512xf32, #tpu.memory_space<vmem>>, vector<1x512xf32>
    %10 = vector.broadcast %9 : vector<1x512xf32> to vector<8x512xf32>
    %11 = arith.addf %8, %10 : vector<8x512xf32>
    %cst_10 = arith.constant 0.000000e+00 : f32
    %12 = vector.broadcast %cst_10 : f32 to vector<8x512xf32>
    %13 = arith.maximumf %11, %12 : vector<8x512xf32>
    %14 = vector.extract_strided_slice %13 {offsets = [0, 0], sizes = [8, 256], strides = [1, 1]} : vector<8x512xf32> to vector<8x256xf32>
    %15 = vector.extract_strided_slice %13 {offsets = [0, 256], sizes = [8, 256], strides = [1, 1]} : vector<8x512xf32> to vector<8x256xf32>
    %c0_11 = arith.constant 0 : index
    %c0_12 = arith.constant 0 : index
    %16 = vector.load %arg5[%c0_11, %c0_12] : memref<256x256xbf16, #tpu.memory_space<vmem>>, vector<256x256xbf16>
    %17 = arith.extf %16 : vector<256x256xbf16> to vector<256x256xf32>
    %cst_13 = arith.constant dense<0.000000e+00> : vector<8x256xf32>
    %18 = tpu.matmul %14, %17, %cst_13 {dimension_numbers = #tpu.dot_dimension_numbers<[1], [0], [0], [1], [0, 0, 1, 1], [], []>} : vector<8x256xf32>, vector<256x256xf32>, vector<8x256xf32> -> vector<8x256xf32>
    %c0_14 = arith.constant 0 : index
    %c0_15 = arith.constant 0 : index
    %19 = vector.load %arg6[%c0_14, %c0_15] : memref<1x256xf32, #tpu.memory_space<vmem>>, vector<1x256xf32>
    %20 = vector.broadcast %19 : vector<1x256xf32> to vector<8x256xf32>
    %21 = arith.addf %18, %20 : vector<8x256xf32>
    %cst_16 = arith.constant 0.000000e+00 : f32
    %22 = vector.broadcast %cst_16 : f32 to vector<8x256xf32>
    %23 = arith.maximumf %21, %22 : vector<8x256xf32>
    %c0_17 = arith.constant 0 : index
    %c0_18 = arith.constant 0 : index
    %24 = vector.load %arg7[%c0_17, %c0_18] : memref<256x256xbf16, #tpu.memory_space<vmem>>, vector<256x256xbf16>
    %25 = arith.extf %24 : vector<256x256xbf16> to vector<256x256xf32>
    %cst_19 = arith.constant dense<0.000000e+00> : vector<8x256xf32>
    %26 = tpu.matmul %15, %25, %cst_19 {dimension_numbers = #tpu.dot_dimension_numbers<[1], [0], [0], [1], [0, 0, 1, 1], [], []>} : vector<8x256xf32>, vector<256x256xf32>, vector<8x256xf32> -> vector<8x256xf32>
    %c0_20 = arith.constant 0 : index
    %c0_21 = arith.constant 0 : index
    %27 = vector.load %arg8[%c0_20, %c0_21] : memref<1x256xf32, #tpu.memory_space<vmem>>, vector<1x256xf32>
    %28 = vector.broadcast %27 : vector<1x256xf32> to vector<8x256xf32>
    %29 = arith.addf %26, %28 : vector<8x256xf32>
    %cst_22 = arith.constant 0.000000e+00 : f32
    %30 = vector.broadcast %cst_22 : f32 to vector<8x256xf32>
    %31 = arith.maximumf %29, %30 : vector<8x256xf32>
    %32 = tpu.concatenate %23, %31 in 1 : vector<8x256xf32>, vector<8x256xf32> -> vector<8x512xf32>
    %c0_23 = arith.constant 0 : index
    %c0_24 = arith.constant 0 : index
    %33 = vector.load %arg9[%c0_23, %c0_24] : memref<512x2xbf16, #tpu.memory_space<vmem>>, vector<512x2xbf16>
    %34 = arith.extf %33 : vector<512x2xbf16> to vector<512x2xf32>
    %cst_25 = arith.constant dense<0.000000e+00> : vector<8x2xf32>
    %35 = tpu.matmul %32, %34, %cst_25 {dimension_numbers = #tpu.dot_dimension_numbers<[1], [0], [0], [1], [0, 0, 1, 1], [], []>} : vector<8x512xf32>, vector<512x2xf32>, vector<8x2xf32> -> vector<8x2xf32>
    %c0_26 = arith.constant 0 : index
    %c0_27 = arith.constant 0 : index
    %36 = vector.load %arg10[%c0_26, %c0_27] : memref<1x2xf32, #tpu.memory_space<vmem>>, vector<1x2xf32>
    %37 = vector.broadcast %36 : vector<1x2xf32> to vector<8x2xf32>
    %38 = arith.addf %35, %37 : vector<8x2xf32>
    %c0_28 = arith.constant 0 : index
    %c0_29 = arith.constant 0 : index
    %39 = vector.load %arg11[%c0_28, %c0_29] : memref<8x2xf32, #tpu.memory_space<vmem>>, vector<8x2xf32>
    tpu.vector_store %arg11[%c0_28, %c0_29], %38 {strides = array<i32>} : memref<8x2xf32, #tpu.memory_space<vmem>>, vector<8x2xf32>,
    return
  }
}

</mosaic_0001>

<bundles_post_ra>
// kernel: tpu_custom_call.1
= control target key start
LH: loop header
LB: loop body
LE: loop exit
PB: predicated region body
PF: predicated region fallthrough
CT: control target
= control target key end

     0   :  { %16 = vsyncpa [#allocation3], 0  ;;  %s2134_s0 = inlined_call_operand.hbm [shape: f32[8,24], index: 0, kind: input, shape index: {}]   ;;  %s2135_s1 = inlined_call_operand.hbm [shape: f32[8,8], index: 1, kind: input, shape index: {}]   ;;  %s2136_s2 = inlined_call_operand.hbm [shape: bf16[24,512], index: 2, kind: input, shape index: {}]   ;;  %s2137_s3 = inlined_call_operand.vmem [shape: bf16[8,512], index: 3, kind: input, shape index: {}]   ;;  %s2138_s4 = inlined_call_operand.vmem [shape: f32[1,512], index: 4, kind: input, shape index: {}]   ;;  %s2139_s5 = inlined_call_operand.vmem [shape: bf16[256,256], index: 5, kind: input, shape index: {}]   ;;  %s2140_s6 = inlined_call_operand.vmem [shape: f32[1,256], index: 6, kind: input, shape index: {}]   ;;  %s2141_s7 = inlined_call_operand.hbm [shape: bf16[256,256], index: 7, kind: input, shape index: {}]   ;;  %s2142_s8 = inlined_call_operand.vmem [shape: f32[1,256], index: 8, kind: input, shape index: {}]   ;;  %s2143_s9 = inlined_call_operand.vmem [shape: bf16[512,2], index: 9, kind: input, shape index: {}]   ;;  %s2144_s10 = inlined_call_operand.vmem [shape: f32[1,2], index: 10, kind: input, shape index: {}]   ;;  %s2145_s11 = inlined_call_operand.vmem [shape: f32[8,2], index: 11, kind: output, shape index: {}]  }
   0x1   :  { %17 = vsyncpa [#allocation5], 0 }
   0x2   :  { %18 = vsyncpa [#allocation8], 0  ;;  %s1794_s17 = smov [#allocation4]   ;;  %s1795_s19 = smov [#allocation2]  }
   0x3   :  { %s35_s18 = sshll.u32 %s1794_s17, 4  ;;  %s25_s20 = sshll.u32 %s1795_s19, 4  ;;  %s36_s18 = int_to_ptr.vmem [resolvable:$true] %s35_s18  ;;  %s26_s20 = int_to_ptr.vmem [resolvable:$true] %s25_s20 }
   0x4   :  { %s1700_s23 = scalar_lea.hbm %s2135_s1, 128 }
   0x5   :  { %p1701_p0 = scmp.ne.s32.totalorder %s2135_s1, %s1700_s23  ;;  %p1704_p1 = scmp.lt.u32.totalorder %s1700_s23, %s2135_s1 }
   0x7   :  { %p1706_p2 = pnand %p1704_p1, %p1701_p0 }
   0x9   :  { %1709 = shalt.err (!%p1706_p2)
}
   0xa   :  { %s1710_s28 = scalar_lea.vmem %s36_s18, 128  ;;  %p1715_p4 = scmp.lt.s32.totalorder %s36_s18, %s36_s18 }
   0xb   :  { %p1711_p3 = scmp.ne.s32.totalorder %s36_s18, %s1710_s28  ;;  %p1716_p5 = scmp.lt.s32.totalorder %s1710_s28, %s1710_s28 }
   0xd   :  { %p1717_p6 = por %p1716_p5, %p1715_p4 }
   0xf   :  { %p1718_p7 = pnand %p1717_p6, %p1711_p3 }
  0x11   :  { %1721 = shalt.err (!%p1718_p7)
}
  0x12   :  { %38 = dma.hbm_to_vmem [thread:$0]  %s2135_s1, 128, %s36_s18, [#allocation5]  }
  0x13   :  { %s1722_s14 = scalar_lea.hbm %s2134_s0, 128 }
  0x14   :  { %p1723_p8 = scmp.ne.s32.totalorder %s2134_s0, %s1722_s14  ;;  %p1726_p9 = scmp.lt.u32.totalorder %s1722_s14, %s2134_s0 }
  0x16   :  { %p1728_p10 = pnand %p1726_p9, %p1723_p8 }
  0x18   :  { %1731 = shalt.err (!%p1728_p10)
}
  0x19   :  { %s1732_s21 = scalar_lea.vmem %s26_s20, 128  ;;  %p1737_p12 = scmp.lt.s32.totalorder %s26_s20, %s26_s20 }
  0x1a   :  { %p1733_p11 = scmp.ne.s32.totalorder %s26_s20, %s1732_s21  ;;  %p1738_p13 = scmp.lt.s32.totalorder %s1732_s21, %s1732_s21 }
  0x1c   :  { %p1739_p0 = por %p1738_p13, %p1737_p12 }
  0x1e   :  { %p1740_p1 = pnand %p1739_p0, %p1733_p11 }
  0x20   :  { %1743 = shalt.err (!%p1740_p1)
}
  0x21   :  { %28 = dma.hbm_to_vmem [thread:$0]  %s2134_s0, 128, %s26_s20, [#allocation3]  }
  0x22   :  { %s1796_s22 = smov [#allocation6]   ;;  %s1744_s26 = scalar_lea.hbm %s2136_s2, 768 }
  0x23   :  { %s44_s23 = sshll.u32 %s1796_s22, 4  ;;  %p1745_p2 = scmp.ne.s32.totalorder %s2136_s2, %s1744_s26  ;;  %s45_s23 = int_to_ptr.vmem [resolvable:$true] %s44_s23 }
  0x24   :  { %p1748_p3 = scmp.lt.u32.totalorder %s1744_s26, %s2136_s2 }
  0x26   :  { %p1750_p4 = pnand %p1748_p3, %p1745_p2 }
  0x28   :  { %1753 = shalt.err (!%p1750_p4)
}
  0x29   :  { %s1754_s12 = scalar_lea.vmem %s45_s23, 768  ;;  %p1759_p6 = scmp.lt.s32.totalorder %s45_s23, %s45_s23 }
  0x2a   :  { %p1755_p5 = scmp.ne.s32.totalorder %s45_s23, %s1754_s12  ;;  %p1760_p7 = scmp.lt.s32.totalorder %s1754_s12, %s1754_s12 }
  0x2c   :  { %p1761_p8 = por %p1760_p7, %p1759_p6 }
  0x2e   :  { %p1762_p9 = pnand %p1761_p8, %p1755_p5 }
  0x30   :  { %1765 = shalt.err (!%p1762_p9)
}
  0x31   :  { %s1797_s0 = smov 256   ;;  %s1798_s20 = smov 16  }
  0x32   :  { %50 = dma.hbm_to_vmem [thread:$0]  %s2136_s2, 768, %s45_s23, [#allocation5], %s1797_s0, %s1797_s0, %s1798_s20  }
  0x33   :  { %s1799_s15 = smov [#allocation7]   ;;  %s1766_s21 = scalar_lea.hbm %s2141_s7, 4096 }
  0x34   :  { %s64_s16 = sshll.u32 %s1799_s15, 4  ;;  %p1767_p10 = scmp.ne.s32.totalorder %s2141_s7, %s1766_s21  ;;  %s65_s16 = int_to_ptr.vmem [resolvable:$true] %s64_s16 }
  0x35   :  { %p1770_p11 = scmp.lt.u32.totalorder %s1766_s21, %s2141_s7 }
  0x37   :  { %p1772_p12 = pnand %p1770_p11, %p1767_p10 }
  0x39   :  { %1775 = shalt.err (!%p1772_p12)
}
  0x3a   :  { %s1776_s25 = scalar_lea.vmem %s65_s16, 4096  ;;  %p1781_p0 = scmp.lt.s32.totalorder %s65_s16, %s65_s16 }
  0x3b   :  { %p1777_p13 = scmp.ne.s32.totalorder %s65_s16, %s1776_s25  ;;  %p1782_p1 = scmp.lt.s32.totalorder %s1776_s25, %s1776_s25 }
  0x3d   :  { %p1783_p2 = por %p1782_p1, %p1781_p0 }
  0x3f   :  { %p1784_p3 = pnand %p1783_p2, %p1777_p13 }
  0x41   :  { %1787 = shalt.err (!%p1784_p3)
}
  0x42   :  { %s1800_s2 = smov 128   ;;  %s1801_s23 = smov 8  }
  0x43   :  { %70 = dma.hbm_to_vmem [thread:$0]  %s2141_s7, 4096, %s65_s16, [#allocation8], %s1800_s2, %s1800_s2, %s1801_s23  }
  0x44   :  { %1788 = dma.done.wait [#allocation3], 128  }
  0x45   :  { %1789 = vsyncadd [#allocation3], 4294967168 }
  0x46   :  { %1790 = dma.done.wait [#allocation5], 896  }
  0x47   :  { %1791 = vsyncadd [#allocation5], 4294966400 }
  0x48   :  { %1792 = dma.done.wait [#allocation8], 4096  }
  0x49   :  { %1793 = vsyncadd [#allocation8], 4294963200  ;;  %v1802_v0 = vmov 0.0   ;;  %v109_v1 = vld [vmem:[%s2137_s3] sm:$0xff]  ;;  %v110_v2 = vld [vmem:[%s2137_s3 + $0x8] sm:$0xff]  ;;  %vm115_vm0 = vcmask 64512  }
  0x4a   :  { %183 = vmatprep.mubr.f32.mxu0 %v1802_v0  ;;  %254 = vmatprep.mubr.f32.mxu1 %v1802_v0  ;;  %v90_v3 = vld [vmem:[#allocation4] sm:$0xff]  ;;  %v112_v4 = vunpack.c.h.bf16 %v109_v1  ;;  %v114_v5 = vunpack.c.h.bf16 %v110_v2  ;;  %v111_v6 = vunpack.c.l.bf16 %v109_v1  ;;  %v113_v7 = vunpack.c.l.bf16 %v110_v2  ;;  %v1598_v8 = vld [vmem:[#allocation6 + $0x4] ss:$16 sps:$4 sm:$0xff]   ;;  %v1600_v9 = vld [vmem:[#allocation6] ss:$16 sps:$4 sm:$0xff]  }
  0x4b   :  { %v1601_v10 = vld [vmem:[#allocation6 + $0xc] ss:$16 sps:$4 sm:$0xff]   ;;  %v1603_v11 = vld [vmem:[#allocation6 + $0x8] ss:$16 sps:$4 sm:$0xff]   ;;  %v95_v12 = vld [vmem:[#allocation6 + $0x20] sm:$0xff]  ;;  %vm261_vm1 = vcmask 195584  }
  0x4c   :  { %119 = vmatprep.subr.mxu0 %v112_v4  ;;  %190 = vmatprep.subr.mxu1 %v114_v5  ;;  %v106_v13 = vunpack.c.h.bf16 %v95_v12  ;;  %v96_v14 = vld [vmem:[#allocation6 + $0x28] sm:$0xff]  ;;  %v105_v16 = vunpack.c.l.bf16 %v95_v12  ;;  %v89_v18 = vld [vmem:[#allocation2] sm:$0xff]  ;;  %vm1074_vm2 = vcmask 15360  }
  0x4d   :  { %120 = vmatpush1.msra.mxu0 %v111_v6  ;;  %191 = vmatpush1.msra.mxu1 %v113_v7  ;;  %v108_v15 = vunpack.c.h.bf16 %v96_v14  ;;  %v107_v17 = vunpack.c.l.bf16 %v96_v14  ;;  %v1604_v19 = vld [vmem:[%s2139_s5 + $0x4] ss:$8 sps:$4 sm:$0xff]   ;;  %v1606_v21 = vld [vmem:[%s2139_s5] ss:$8 sps:$4 sm:$0xff]   ;;  %v1610_v23 = vld [vmem:[%s2139_s5 + $0x14] ss:$8 sps:$4 sm:$0xff]  }
  0x4e   :  { %1083 = vmatmul.mubr.msk.f32.vlgmr.msra.gmra.mrb[0].mxu0 %vm115_vm0, %v90_v3  ;;  %1084 = vmatmul.mubr.msk.f32.vlgmr.msra.gmra.mrb[0].mxu1 %vm115_vm0, %v90_v3  ;;  %v1607_v20 = vld [vmem:[#allocation7 + $0x4] ss:$8 sps:$4 sm:$0xff]   ;;  %v1609_v22 = vld [vmem:[#allocation7] ss:$8 sps:$4 sm:$0xff]   ;;  %v1613_v24 = vld [vmem:[#allocation7 + $0x14] ss:$8 sps:$4 sm:$0xff]  }
  0x4f   :  { %1318 = vmatprep.subr.bf16.mxu0 %v1598_v8  ;;  %1322 = vmatprep.subr.bf16.mxu1 %v1601_v10  ;;  %v1612_v25 = vld [vmem:[%s2139_s5 + $0x10] ss:$8 sps:$4 sm:$0xff]   ;;  %v1616_v27 = vld [vmem:[%s2139_s5 + $0x24] ss:$8 sps:$4 sm:$0xff]   ;;  %v1618_v29 = vld [vmem:[%s2139_s5 + $0x20] ss:$8 sps:$4 sm:$0xff]  }
  0x50   :  { %1320 = vmatpush1.bf16.msra.mxu0 %v1600_v9  ;;  %1324 = vmatpush1.bf16.msra.mxu1 %v1603_v11  ;;  %v1615_v26 = vld [vmem:[#allocation7 + $0x10] ss:$8 sps:$4 sm:$0xff]   ;;  %v1619_v28 = vld [vmem:[#allocation7 + $0x24] ss:$8 sps:$4 sm:$0xff]   ;;  %v1621_v30 = vld [vmem:[#allocation7 + $0x20] ss:$8 sps:$4 sm:$0xff]  }
  0x51   :  { %269 = vmatprep.subr.mxu0 %v106_v13  ;;  %340 = vmatprep.subr.mxu1 %v108_v15  ;;  %v1622_v31 = vld [vmem:[%s2139_s5 + $0x34] ss:$8 sps:$4 sm:$0xff]   ;;  %v1624_v33 = vld [vmem:[%s2139_s5 + $0x30] ss:$8 sps:$4 sm:$0xff]   ;;  %v1628_v35 = vld [vmem:[%s2139_s5 + $0x44] ss:$8 sps:$4 sm:$0xff]  }
  0x52   :  { %329 = vmatprep.mubr.f32.mxu0 %v1802_v0  ;;  %400 = vmatprep.mubr.f32.mxu1 %v1802_v0  ;;  %v1625_v32 = vld [vmem:[#allocation7 + $0x34] ss:$8 sps:$4 sm:$0xff]   ;;  %v1627_v34 = vld [vmem:[#allocation7 + $0x30] ss:$8 sps:$4 sm:$0xff]   ;;  %v1631_v36 = vld [vmem:[#allocation7 + $0x44] ss:$8 sps:$4 sm:$0xff]  }
  0x53   :  { %v1630_v37 = vld [vmem:[%s2139_s5 + $0x40] ss:$8 sps:$4 sm:$0xff]   ;;  %v1634_v39 = vld [vmem:[%s2139_s5 + $0x54] ss:$8 sps:$4 sm:$0xff]   ;;  %v1636_v41 = vld [vmem:[%s2139_s5 + $0x50] ss:$8 sps:$4 sm:$0xff]  }
  0x54   :  { %270 = vmatpush1.msra.mxu0 %v105_v16  ;;  %341 = vmatpush1.msra.mxu1 %v107_v17  ;;  %v1633_v38 = vld [vmem:[#allocation7 + $0x40] ss:$8 sps:$4 sm:$0xff]   ;;  %v1637_v40 = vld [vmem:[#allocation7 + $0x54] ss:$8 sps:$4 sm:$0xff]   ;;  %v1639_v42 = vld [vmem:[#allocation7 + $0x50] ss:$8 sps:$4 sm:$0xff]  }
  0x55   :  { %1326 = vmatprep.subr.bf16.mxu0 %v1604_v19  ;;  %1390 = vmatprep.subr.bf16.mxu1 %v1607_v20  ;;  %v1640_v43 = vld [vmem:[%s2139_s5 + $0x64] ss:$8 sps:$4 sm:$0xff]   ;;  %v1642_v45 = vld [vmem:[%s2139_s5 + $0x60] ss:$8 sps:$4 sm:$0xff]   ;;  %v1646_v47 = vld [vmem:[%s2139_s5 + $0x74] ss:$8 sps:$4 sm:$0xff]  }
  0x56   :  { %1085 = vmatmul.mubr.msk.f32.vlgmr.msra.gmra.mrb[0].mxu0 %vm261_vm1, %v89_v18  ;;  %1086 = vmatmul.mubr.msk.f32.vlgmr.msra.gmra.mrb[0].mxu1 %vm261_vm1, %v89_v18  ;;  %v1643_v44 = vld [vmem:[#allocation7 + $0x64] ss:$8 sps:$4 sm:$0xff]   ;;  %v1645_v46 = vld [vmem:[#allocation7 + $0x60] ss:$8 sps:$4 sm:$0xff]   ;;  %v1649_v48 = vld [vmem:[#allocation7 + $0x74] ss:$8 sps:$4 sm:$0xff]  }
  0x57   :  { %1328 = vmatpush1.bf16.msra.mxu0 %v1606_v21  ;;  %1392 = vmatpush1.bf16.msra.mxu1 %v1609_v22  ;;  %v1648_v49 = vld [vmem:[%s2139_s5 + $0x70] ss:$8 sps:$4 sm:$0xff]   ;;  %v1652_v51 = vld [vmem:[%s2139_s5 + $0x84] ss:$8 sps:$4 sm:$0xff]   ;;  %v1654_v53 = vld [vmem:[%s2139_s5 + $0x80] ss:$8 sps:$4 sm:$0xff]   ;;  %v409_v21 = vlaneseq }
  0x58   :  { %1330 = vmatprep.subr.bf16.mxu0 %v1610_v23  ;;  %1394 = vmatprep.subr.bf16.mxu1 %v1613_v24  ;;  %v1651_v50 = vld [vmem:[#allocation7 + $0x70] ss:$8 sps:$4 sm:$0xff]   ;;  %v1655_v52 = vld [vmem:[#allocation7 + $0x84] ss:$8 sps:$4 sm:$0xff]   ;;  %v1657_v54 = vld [vmem:[#allocation7 + $0x80] ss:$8 sps:$4 sm:$0xff]  }
  0x59   :  { %v1658_v55 = vld [vmem:[%s2139_s5 + $0x94] ss:$8 sps:$4 sm:$0xff]   ;;  %v1660_v57 = vld [vmem:[%s2139_s5 + $0x90] ss:$8 sps:$4 sm:$0xff]   ;;  %v1664_v59 = vld [vmem:[%s2139_s5 + $0xa4] ss:$8 sps:$4 sm:$0xff]  }
  0x5a   :  { %v1661_v56 = vld [vmem:[#allocation7 + $0x94] ss:$8 sps:$4 sm:$0xff]   ;;  %v1663_v58 = vld [vmem:[#allocation7 + $0x90] ss:$8 sps:$4 sm:$0xff]   ;;  %v1667_v60 = vld [vmem:[#allocation7 + $0xa4] ss:$8 sps:$4 sm:$0xff]  }
  0x5b   :  { %1332 = vmatpush1.bf16.msra.mxu0 %v1612_v25  ;;  %1396 = vmatpush1.bf16.msra.mxu1 %v1615_v26  ;;  %v1666_v61 = vld [vmem:[%s2139_s5 + $0xa0] ss:$8 sps:$4 sm:$0xff]   ;;  %v1670_v63 = vld [vmem:[%s2139_s5 + $0xb4] ss:$8 sps:$4 sm:$0xff]   ;;  %v1672_v1 = vld [vmem:[%s2139_s5 + $0xb0] ss:$8 sps:$4 sm:$0xff]  }
  0x5c   :  { %1334 = vmatprep.subr.bf16.mxu0 %v1616_v27  ;;  %1398 = vmatprep.subr.bf16.mxu1 %v1619_v28  ;;  %v1669_v62 = vld [vmem:[#allocation7 + $0xa0] ss:$8 sps:$4 sm:$0xff]   ;;  %v1673_v0 = vld [vmem:[#allocation7 + $0xb4] ss:$8 sps:$4 sm:$0xff]   ;;  %v1675_v2 = vld [vmem:[#allocation7 + $0xb0] ss:$8 sps:$4 sm:$0xff]  }
  0x5d   :  { %v1676_v3 = vld [vmem:[%s2139_s5 + $0xc4] ss:$8 sps:$4 sm:$0xff]   ;;  %v1678_v5 = vld [vmem:[%s2139_s5 + $0xc0] ss:$8 sps:$4 sm:$0xff]   ;;  %v1682_v7 = vld [vmem:[%s2139_s5 + $0xd4] ss:$8 sps:$4 sm:$0xff]  }
  0x5e   :  { %v1679_v4 = vld [vmem:[#allocation7 + $0xc4] ss:$8 sps:$4 sm:$0xff]   ;;  %v1681_v6 = vld [vmem:[#allocation7 + $0xc0] ss:$8 sps:$4 sm:$0xff]   ;;  %v1685_v8 = vld [vmem:[#allocation7 + $0xd4] ss:$8 sps:$4 sm:$0xff]  }
  0x5f   :  { %1336 = vmatpush1.bf16.msra.mxu0 %v1618_v29  ;;  %1400 = vmatpush1.bf16.msra.mxu1 %v1621_v30  ;;  %v1684_v9 = vld [vmem:[%s2139_s5 + $0xd0] ss:$8 sps:$4 sm:$0xff]   ;;  %v1688_v11 = vld [vmem:[%s2139_s5 + $0xe4] ss:$8 sps:$4 sm:$0xff]   ;;  %v1690_v13 = vld [vmem:[%s2139_s5 + $0xe0] ss:$8 sps:$4 sm:$0xff]  }
  0x60   :  { %1338 = vmatprep.subr.bf16.mxu0 %v1622_v31  ;;  %1402 = vmatprep.subr.bf16.mxu1 %v1625_v32  ;;  %v1687_v10 = vld [vmem:[#allocation7 + $0xd0] ss:$8 sps:$4 sm:$0xff]   ;;  %v1691_v12 = vld [vmem:[#allocation7 + $0xe4] ss:$8 sps:$4 sm:$0xff]   ;;  %v1693_v14 = vld [vmem:[#allocation7 + $0xe0] ss:$8 sps:$4 sm:$0xff]  }
  0x61   :  { %v1694_v15 = vld [vmem:[%s2139_s5 + $0xf4] ss:$8 sps:$4 sm:$0xff]   ;;  %v1696_v17 = vld [vmem:[%s2139_s5 + $0xf0] ss:$8 sps:$4 sm:$0xff]   ;;  %v1223_v19 = vld [vmem:[%s2143_s9 + $0x40] sm:$0xff]   ;;  %v410_v22 = vshrl.u32 %v409_v21, 7 }
  0x62   :  { %v1697_v16 = vld [vmem:[#allocation7 + $0xf4] ss:$8 sps:$4 sm:$0xff]   ;;  %v1699_v18 = vld [vmem:[#allocation7 + $0xf0] ss:$8 sps:$4 sm:$0xff]   ;;  %v1239_v20 = vld [vmem:[%s2143_s9 + $0xc0] sm:$0xff]  }
  0x63   :  { %1340 = vmatpush1.bf16.msra.mxu0 %v1624_v33  ;;  %1404 = vmatpush1.bf16.msra.mxu1 %v1627_v34  ;;  %v2019_v23 = vsub.s32 0, %v410_v22  ;;  %v419_v24 = vsub.s32 2, %v410_v22  ;;  %v407_v25 = vld [vmem:[%s2138_s4] sm:$0xf]  ;;  %v2024_v26 = vsub.s32 1, %v410_v22  ;;  %v423_v27 = vsub.s32 3, %v410_v22 }
  0x64   :  { %1342 = vmatprep.subr.bf16.mxu0 %v1628_v35  ;;  %1406 = vmatprep.subr.bf16.mxu1 %v1631_v36 }
  0x65   :  { %v412_v28 = vrot.slane %v407_v25, %v2019_v23  ;;  %v420_v29 = vrot.slane %v407_v25, %v419_v24  ;;  %v416_v30 = vrot.slane %v407_v25, %v2024_v26  ;;  %v424_v31 = vrot.slane %v407_v25, %v423_v27 }
  0x67   :  { %1344 = vmatpush1.bf16.msra.mxu0 %v1630_v37  ;;  %1408 = vmatpush1.bf16.msra.mxu1 %v1633_v38 }
  0x68   :  { %1346 = vmatprep.subr.bf16.mxu0 %v1634_v39  ;;  %1410 = vmatprep.subr.bf16.mxu1 %v1637_v40 }
  0x6b   :  { %1348 = vmatpush1.bf16.msra.mxu0 %v1636_v41  ;;  %1412 = vmatpush1.bf16.msra.mxu1 %v1639_v42 }
  0x6c   :  { %1350 = vmatprep.subr.bf16.mxu0 %v1640_v43  ;;  %1414 = vmatprep.subr.bf16.mxu1 %v1643_v44  ;;  %v1089_v44 = vld [vmem:[%s2143_s9] sm:$0xff]  }
  0x6f   :  { %1352 = vmatpush1.bf16.msra.mxu0 %v1642_v45  ;;  %1416 = vmatpush1.bf16.msra.mxu1 %v1645_v46  ;;  %v1231_v45 = vld [vmem:[%s2143_s9 + $0x80] sm:$0xff]   ;;  %v1224_v46 = vld [vmem:[%s2143_s9 + $0x48] sm:$0xff]  }
  0x70   :  { %1354 = vmatprep.subr.bf16.mxu0 %v1646_v47  ;;  %1418 = vmatprep.subr.bf16.mxu1 %v1649_v48  ;;  %v1240_v47 = vld [vmem:[%s2143_s9 + $0xc8] sm:$0xff]  }
  0x71   :  { %v1216_v48 = vld [vmem:[%s2143_s9 + $0x8] sm:$0xff]  }
  0x73   :  { %1356 = vmatpush1.bf16.msra.mxu0 %v1648_v49  ;;  %1420 = vmatpush1.bf16.msra.mxu1 %v1651_v50  ;;  %v1232_v49 = vld [vmem:[%s2143_s9 + $0x88] sm:$0xff]   ;;  %v1225_v50 = vld [vmem:[%s2143_s9 + $0x50] sm:$0xff]  }
  0x74   :  { %1358 = vmatprep.subr.bf16.mxu0 %v1652_v51  ;;  %1422 = vmatprep.subr.bf16.mxu1 %v1655_v52  ;;  %v1241_v51 = vld [vmem:[%s2143_s9 + $0xd0] sm:$0xff]  }
  0x75   :  { %v1217_v52 = vld [vmem:[%s2143_s9 + $0x10] sm:$0xff]  }
  0x77   :  { %1360 = vmatpush1.bf16.msra.mxu0 %v1654_v53  ;;  %1424 = vmatpush1.bf16.msra.mxu1 %v1657_v54  ;;  %v1233_v53 = vld [vmem:[%s2143_s9 + $0x90] sm:$0xff]   ;;  %v1226_v54 = vld [vmem:[%s2143_s9 + $0x58] sm:$0xff]  }
  0x78   :  { %1362 = vmatprep.subr.bf16.mxu0 %v1658_v55  ;;  %1426 = vmatprep.subr.bf16.mxu1 %v1661_v56  ;;  %v1242_v55 = vld [vmem:[%s2143_s9 + $0xd8] sm:$0xff]  }
  0x79   :  { %v1218_v56 = vld [vmem:[%s2143_s9 + $0x18] sm:$0xff]  }
  0x7b   :  { %1364 = vmatpush1.bf16.msra.mxu0 %v1660_v57  ;;  %1428 = vmatpush1.bf16.msra.mxu1 %v1663_v58  ;;  %v1234_v57 = vld [vmem:[%s2143_s9 + $0x98] sm:$0xff]   ;;  %v1227_v58 = vld [vmem:[%s2143_s9 + $0x60] sm:$0xff]  }
  0x7c   :  { %1366 = vmatprep.subr.bf16.mxu0 %v1664_v59  ;;  %1430 = vmatprep.subr.bf16.mxu1 %v1667_v60  ;;  %v1243_v59 = vld [vmem:[%s2143_s9 + $0xe0] sm:$0xff]  }
  0x7d   :  { %v1219_v60 = vld [vmem:[%s2143_s9 + $0x20] sm:$0xff]  }
  0x7f   :  { %1368 = vmatpush1.bf16.msra.mxu0 %v1666_v61  ;;  %1432 = vmatpush1.bf16.msra.mxu1 %v1669_v62  ;;  %v1235_v61 = vld [vmem:[%s2143_s9 + $0xa0] sm:$0xff]   ;;  %v1228_v62 = vld [vmem:[%s2143_s9 + $0x68] sm:$0xff]  }
  0x80   :  { %1370 = vmatprep.subr.bf16.mxu0 %v1670_v63  ;;  %1434 = vmatprep.subr.bf16.mxu1 %v1673_v0  ;;  %v1244_v63 = vld [vmem:[%s2143_s9 + $0xe8] sm:$0xff]  }
  0x81   :  { %v1220_v0 = vld [vmem:[%s2143_s9 + $0x28] sm:$0xff]  }
  0x83   :  { %1372 = vmatpush1.bf16.msra.mxu0 %v1672_v1  ;;  %1436 = vmatpush1.bf16.msra.mxu1 %v1675_v2  ;;  %v1236_v1 = vld [vmem:[%s2143_s9 + $0xa8] sm:$0xff]   ;;  %v1229_v2 = vld [vmem:[%s2143_s9 + $0x70] sm:$0xff]  }
  0x84   :  { %1374 = vmatprep.subr.bf16.mxu0 %v1676_v3  ;;  %1438 = vmatprep.subr.bf16.mxu1 %v1679_v4  ;;  %v1245_v3 = vld [vmem:[%s2143_s9 + $0xf0] sm:$0xff]  }
  0x85   :  { %v1221_v4 = vld [vmem:[%s2143_s9 + $0x30] sm:$0xff]  }
  0x87   :  { %1376 = vmatpush1.bf16.msra.mxu0 %v1678_v5  ;;  %1440 = vmatpush1.bf16.msra.mxu1 %v1681_v6  ;;  %v1237_v5 = vld [vmem:[%s2143_s9 + $0xb0] sm:$0xff]   ;;  %v1230_v6 = vld [vmem:[%s2143_s9 + $0x78] sm:$0xff]  }
  0x88   :  { %1378 = vmatprep.subr.bf16.mxu0 %v1682_v7  ;;  %1442 = vmatprep.subr.bf16.mxu1 %v1685_v8  ;;  %v1246_v7 = vld [vmem:[%s2143_s9 + $0xf8] sm:$0xff]  }
  0x89   :  { %v1222_v8 = vld [vmem:[%s2143_s9 + $0x38] sm:$0xff]  }
  0x8b   :  { %1380 = vmatpush1.bf16.msra.mxu0 %v1684_v9  ;;  %1444 = vmatpush1.bf16.msra.mxu1 %v1687_v10  ;;  %v1238_v9 = vld [vmem:[%s2143_s9 + $0xb8] sm:$0xff]   ;;  %v533_v10 = vld [vmem:[%s2140_s6] sm:$0x3] }
  0x8c   :  { %1382 = vmatprep.subr.bf16.mxu0 %v1688_v11  ;;  %1446 = vmatprep.subr.bf16.mxu1 %v1691_v12  ;;  %v714_v11 = vld [vmem:[%s2142_s8] sm:$0x3]  ;;  %v538_v12 = vrot.slane %v533_v10, %v2019_v23 }
  0x8f   :  { %1384 = vmatpush1.bf16.msra.mxu0 %v1690_v13  ;;  %1448 = vmatpush1.bf16.msra.mxu1 %v1693_v14  ;;  %v719_v13 = vrot.slane %v714_v11, %v2019_v23  ;;  %v542_v14 = vrot.slane %v533_v10, %v2024_v26 }
  0x90   :  { %1386 = vmatprep.subr.bf16.mxu0 %v1694_v15  ;;  %1450 = vmatprep.subr.bf16.mxu1 %v1697_v16  ;;  %v723_v15 = vrot.slane %v714_v11, %v2024_v26  ;;  %v1087_v26 = vld [vmem:[%s2144_s10] ss:$0 sm:$0xff] }
  0x93   :  { %1388 = vmatpush1.bf16.msra.mxu0 %v1696_v17  ;;  %1452 = vmatpush1.bf16.msra.mxu1 %v1699_v18 }
  0x94   :  { %1454 = vmatprep.subr.bf16.mxu0 %v1223_v19  ;;  %1486 = vmatprep.subr.bf16.mxu1 %v1239_v20 }
 0x129   :  { %v331_v32 = vpop.f32.mrb[0].mxu0  ;;  %v402_v33 = vpop.f32.mrb[0].mxu1 }
 0x12a   :  { %v429_v34 = vadd.f32 %v412_v28, %v331_v32  ;;  %v431_v35 = vadd.f32 %v420_v29, %v402_v33  ;;  %v333_v36 = vpop.f32.mrb[1].mxu0  ;;  %v404_v37 = vpop.f32.mrb[1].mxu1 }
 0x12b   :  { %v430_v38 = vadd.f32 %v416_v30, %v333_v36  ;;  %v432_v39 = vadd.f32 %v424_v31, %v404_v37 }
 0x12c   :  { %v433_v42 = vmax.f32 %v429_v34, 0.0  ;;  %v435_v43 = vmax.f32 %v431_v35, 0.0 }
 0x12d   :  { %v434_v40 = vmax.f32 %v430_v38, 0.0  ;;  %v436_v41 = vmax.f32 %v432_v39, 0.0 }
 0x12f   :  { %609 = vmatprep.mubr.f32.mxu0 %v434_v40  ;;  %790 = vmatprep.mubr.f32.mxu1 %v436_v41 }
 0x130   :  { %610 = vmatmul.mubr.f32.vlgmr.msra.gmra.mrb[2].mxu0 %v433_v42  ;;  %791 = vmatmul.mubr.f32.vlgmr.msra.gmra.mrb[2].mxu1 %v435_v43 }
 0x131   :  { %1456 = vmatpush3.bf16.msra.mxu0 %v1089_v44  ;;  %1488 = vmatpush3.bf16.msra.mxu1 %v1231_v45 }
 0x132   :  { %1458 = vmatprep.subr.bf16.mxu0 %v1224_v46  ;;  %1490 = vmatprep.subr.bf16.mxu1 %v1240_v47 }
 0x135   :  { %1460 = vmatpush3.bf16.msra.mxu0 %v1216_v48  ;;  %1492 = vmatpush3.bf16.msra.mxu1 %v1232_v49 }
 0x136   :  { %1462 = vmatprep.subr.bf16.mxu0 %v1225_v50  ;;  %1494 = vmatprep.subr.bf16.mxu1 %v1241_v51 }
 0x139   :  { %1464 = vmatpush3.bf16.msra.mxu0 %v1217_v52  ;;  %1496 = vmatpush3.bf16.msra.mxu1 %v1233_v53 }
 0x13a   :  { %1466 = vmatprep.subr.bf16.mxu0 %v1226_v54  ;;  %1498 = vmatprep.subr.bf16.mxu1 %v1242_v55 }
 0x13d   :  { %1468 = vmatpush3.bf16.msra.mxu0 %v1218_v56  ;;  %1500 = vmatpush3.bf16.msra.mxu1 %v1234_v57 }
 0x13e   :  { %1470 = vmatprep.subr.bf16.mxu0 %v1227_v58  ;;  %1502 = vmatprep.subr.bf16.mxu1 %v1243_v59 }
 0x141   :  { %1472 = vmatpush3.bf16.msra.mxu0 %v1219_v60  ;;  %1504 = vmatpush3.bf16.msra.mxu1 %v1235_v61 }
 0x142   :  { %1474 = vmatprep.subr.bf16.mxu0 %v1228_v62  ;;  %1506 = vmatprep.subr.bf16.mxu1 %v1244_v63 }
 0x145   :  { %1476 = vmatpush3.bf16.msra.mxu0 %v1220_v0  ;;  %1508 = vmatpush3.bf16.msra.mxu1 %v1236_v1 }
 0x146   :  { %1478 = vmatprep.subr.bf16.mxu0 %v1229_v2  ;;  %1510 = vmatprep.subr.bf16.mxu1 %v1245_v3 }
 0x149   :  { %1480 = vmatpush3.bf16.msra.mxu0 %v1221_v4  ;;  %1512 = vmatpush3.bf16.msra.mxu1 %v1237_v5 }
 0x14a   :  { %1482 = vmatprep.subr.bf16.mxu0 %v1230_v6  ;;  %1514 = vmatprep.subr.bf16.mxu1 %v1246_v7 }
 0x14d   :  { %1484 = vmatpush3.bf16.msra.mxu0 %v1222_v8  ;;  %1516 = vmatpush3.bf16.msra.mxu1 %v1238_v9 }
 0x203   :  { %v611_v16 = vpop.f32.mrb[2].mxu0  ;;  %v792_v17 = vpop.f32.mrb[2].mxu1 }
 0x204   :  { %v612_v18 = vadd.f32 %v611_v16, %v538_v12  ;;  %v793_v19 = vadd.f32 %v792_v17, %v719_v13  ;;  %v613_v20 = vpop.f32.mrb[3].mxu0  ;;  %v794_v21 = vpop.f32.mrb[3].mxu1 }
 0x205   :  { %v614_v22 = vadd.f32 %v613_v20, %v542_v14  ;;  %v795_v24 = vadd.f32 %v794_v21, %v723_v15 }
 0x206   :  { %v616_v28 = vmax.f32 %v612_v18, 0.0  ;;  %v797_v29 = vmax.f32 %v793_v19, 0.0 }
 0x207   :  { %v617_v25 = vmax.f32 %v614_v22, 0.0  ;;  %v798_v27 = vmax.f32 %v795_v24, 0.0 }
 0x209   :  { %998 = vmatprep.mubr.f32.mxu0 %v617_v25  ;;  %1068 = vmatprep.mubr.f32.mxu1 %v798_v27 }
 0x20a   :  { %999 = vmatmul.mubr.f32.vlgmr.msra.gmra.mrb[4].mxu0 %v616_v28  ;;  %1069 = vmatmul.mubr.f32.vlgmr.msra.gmra.mrb[4].mxu1 %v797_v29 }
 0x2dd   :  { %v1279_v23 = vpop.f32.mrb[4].mxu0  ;;  %v1314_v30 = vpop.f32.mrb[4].mxu1 }
 0x2de   :  { %v1280_v31 = vpop.f32.mrb[5].mxu0  ;;  %v1315_v32 = vpop.f32.mrb[5].mxu1 }
 0x2df   :  { %v1281_v33 = vadd.f32 %v1280_v31, %v1279_v23  ;;  %v1316_v34 = vadd.f32 %v1315_v32, %v1314_v30 }
 0x2e1   :  { %v1001_v35 = vadd.f32 %v1281_v33, %v1087_v26 }
 0x2e3   :  { %v1071_v36 = vadd.f32 %v1316_v34, %v1001_v35 }
 0x2e5   :  { %1075 = vst.msk [vmem:[%s2145_s11] sm:$0xff] %vm1074_vm2, %v1071_v36 }
 0x2e6   :  { %1080 = vsyncpa [#allocation3], 1 }
 0x2e7   :  { %1081 = vsyncpa [#allocation5], 1 }
 0x2e8   :  { %1082 = vsyncpa [#allocation8], 1 }

</bundles_post_ra>
